<compile_context>
chip_gen: v7x
topology: tpu7x:2x2x1
jax: 0.10.0
libtpu: 0.0.40
codegen_flags: <defaults>
</compile_context>

<pallas_src>
import jax
import jax.numpy as jnp
from jax.experimental import pallas as pl
from jax.experimental.pallas import tpu as pltpu

H1, H2 = 29, 15            # hidden sizes from Model2.__init__
D_IN, D_OUT = 1, 1

_round8 = lambda n: -(-n // 8) * 8
H1P = _round8(H1)          # 32 (sublane-aligned)
H2P = _round8(H2)          # 16 (sublane-aligned)
PCOLS = 8                  # lane-columns in the packed small-parameter array


def mlp_kernel(x_ref, pk_ref, w2_ref, o_ref):
    x = x_ref[...]                      # (1, N), batch on the 128-lane axis
    pk = pk_ref[...]                    # (32, 8) packed small params (static slices)
    w1 = pk[:, 0:1]                     # (32, 1)  fc1 weight (padded rows are 0)
    b1 = pk[:, 1:2]                     # (32, 1)  fc1 bias
    b2 = pk[:H2P, 2:3]                  # (16, 1)  fc2 bias
    w3 = pk[:H2P, 3:4]                  # (16, 1)  fc3 weight
    b3 = pk[0:1, 4:5]                   # (1, 1)   fc3 bias

    # fc1 (in_features=1): outer product + bias -> pure VPU, no MXU.
    h1 = jnp.maximum(w1 * x + b1, 0.0)                          # (32, N)
    # fc2: small aligned matmul (16,32) @ (32,N) on the MXU; precision pinned
    # so f32 emulation is full-accuracy and identical on v5e/v6e/v7x.
    h2 = jnp.dot(w2_ref[...], h1,
                 preferred_element_type=jnp.float32,
                 precision=jax.lax.Precision.HIGHEST)
    h2 = jnp.maximum(h2 + b2, 0.0)                              # (16, N)
    # fc3 (out_features=1): weighted sublane reduction on VPU/XLU, no MXU.
    out = jnp.sum(w3 * h2, axis=0, keepdims=True) + b3          # (1, N)
    o_ref[...] = out.astype(o_ref.dtype)                        # lane-dense store


def _prep_params(params):
    """PyTorch-layout params -> two packed, zero-padded kernel arrays.

    Returns:
      pk : (32, 8) f32 — columns: [w1, b1, b2, w3, b3, 0, 0, 0]
      w2 : (16, 32) f32 — fc2 weight, zero-padded to sublane alignment
    """
    W1, b1, W2, b2, W3, b3 = params                    # W: (out, in), b: (out,)
    f32 = jnp.float32
    pk = jnp.zeros((H1P, PCOLS), f32)
    pk = pk.at[:H1, 0].set(W1[:, 0].astype(f32))       # fc1 weight (29,)
    pk = pk.at[:H1, 1].set(b1.astype(f32))             # fc1 bias   (29,)
    pk = pk.at[:H2, 2].set(b2.astype(f32))             # fc2 bias   (15,)
    pk = pk.at[:H2, 3].set(W3[0].astype(f32))          # fc3 weight (15,)
    pk = pk.at[0, 4].set(b3.astype(f32)[0])            # fc3 bias   scalar
    w2p = jnp.zeros((H2P, H1P), f32).at[:H2, :H1].set(W2.astype(f32))
    return pk, w2p


def model2_forward(x, params):
    """x: (N, 1) float32. Returns (N, 1) float32 (same math as Model2.forward)."""
    N = x.shape[0]
    pk, w2p = _prep_params(params)

    # Free metadata reshape: (N, 1) and (1, N) share the same row-major buffer.
    x2 = jnp.asarray(x, jnp.float32).reshape(1, N)

    ce = pl.CostEstimate(
        flops=2 * N * (D_IN * H1 + H1 * H2 + H2 * D_OUT),
        transcendentals=0,
        bytes_accessed=8 * N + 4 * (H1P * PCOLS + H2P * H1P),
    )

    out = pl.pallas_call(
        mlp_kernel,
        out_shape=jax.ShapeDtypeStruct((1, N), jnp.float32),
        # Single step: whole batch fits in VMEM with huge headroom; extra grid
        # steps only add fixed per-step overhead at this problem size.
        grid=(1,),
        in_specs=[
            pl.BlockSpec((1, N), lambda i: (0, 0)),        # x, batch on lanes
            pl.BlockSpec((H1P, PCOLS), lambda i: (0, 0)),  # packed small params
            pl.BlockSpec((H2P, H1P), lambda i: (0, 0)),    # fc2 weight
        ],
        out_specs=pl.BlockSpec((1, N), lambda i: (0, 0)),
        compiler_params=pltpu.CompilerParams(
            dimension_semantics=("arbitrary",)),
        cost_estimate=ce,
    )(x2, pk, w2p)

    return out.reshape(N, 1)   # free metadata reshape back to (N, 1)


def init_params(key):
    """Deterministic init mimicking PyTorch Linear's U(-1/sqrt(fan_in), +).
    Stored in PyTorch layout: W (out_features, in_features), b (out_features,)."""
    ks = jax.random.split(key, 6)

    def linear(kw, kb, fan_in, fan_out):
        bound = 1.0 / jnp.sqrt(jnp.float32(fan_in))
        W = jax.random.uniform(kw, (fan_out, fan_in), jnp.float32, -bound, bound)
        b = jax.random.uniform(kb, (fan_out,), jnp.float32, -bound, bound)
        return W, b

    W1, b1 = linear(ks[0], ks[1], D_IN, H1)
    W2, b2 = linear(ks[2], ks[3], H1, H2)
    W3, b3 = linear(ks[4], ks[5], H2, D_OUT)
    return (W1, b1, W2, b2, W3, b3)


def reference_forward(x, params):
    W1, b1, W2, b2, W3, b3 = params
    hp = jax.lax.Precision.HIGHEST      # match the kernel's pinned precision
    h1 = jnp.maximum(jnp.dot(x, W1.T, precision=hp) + b1, 0.0)
    h2 = jnp.maximum(jnp.dot(h1, W2.T, precision=hp) + b2, 0.0)
    return jnp.dot(h2, W3.T, precision=hp) + b3


if __name__ == "__main__":
    key = jax.random.PRNGKey(0)
    params = init_params(key)

    # Small analogue of torch.linspace(-1, 1, 1000).reshape(-1, 1).
    # N deliberately not a multiple of 128 to exercise the non-aligned lane tail.
    N = 250
    x = jnp.linspace(-1.0, 1.0, N, dtype=jnp.float32).reshape(-1, 1)

    fwd = jax.jit(model2_forward)
    y = jax.block_until_ready(fwd(x, params))
    y_ref = reference_forward(x, params)

    assert y.shape == (N, 1)
    assert jnp.allclose(y, y_ref, atol=1e-5, rtol=1e-5)

    print("KERNEL_OK")
</pallas_src>

<mosaic_0001>
module attributes {stable_mosaic.version = 11 : i64} {
  func.func @mlp_kernel(%arg0: i32, %arg1: memref<1x250xf32, #tpu.memory_space<vmem>>, %arg2: memref<32x8xf32, #tpu.memory_space<vmem>>, %arg3: memref<16x32xf32, #tpu.memory_space<vmem>>, %arg4: memref<1x250xf32, #tpu.memory_space<vmem>>) attributes {dimension_semantics = [#tpu.dimension_semantics<arbitrary>], iteration_bounds = array<i64: 1>, scalar_prefetch = 0 : i64, scratch_operands = 0 : i64, tpu.core_type = #tpu.core_type<tc>, window_params = [{pipeline_mode = #tpu.pipeline_mode<synchronous>, transform_indices = @transform_0, window_bounds = array<i64: 1, 250>}, {pipeline_mode = #tpu.pipeline_mode<synchronous>, transform_indices = @transform_1, window_bounds = array<i64: 32, 8>}, {pipeline_mode = #tpu.pipeline_mode<synchronous>, transform_indices = @transform_2, window_bounds = array<i64: 16, 32>}, {pipeline_mode = #tpu.pipeline_mode<synchronous>, transform_indices = @transform_3, window_bounds = array<i64: 1, 250>}]} {
    %c0 = arith.constant 0 : index
    %c0_0 = arith.constant 0 : index
    %0 = vector.load %arg1[%c0, %c0_0] : memref<1x250xf32, #tpu.memory_space<vmem>>, vector<1x250xf32>
    %c0_1 = arith.constant 0 : index
    %c0_2 = arith.constant 0 : index
    %1 = vector.load %arg2[%c0_1, %c0_2] : memref<32x8xf32, #tpu.memory_space<vmem>>, vector<32x8xf32>
    %2 = vector.extract_strided_slice %1 {offsets = [0, 0], sizes = [32, 1], strides = [1, 1]} : vector<32x8xf32> to vector<32x1xf32>
    %3 = vector.extract_strided_slice %1 {offsets = [0, 1], sizes = [32, 1], strides = [1, 1]} : vector<32x8xf32> to vector<32x1xf32>
    %4 = vector.extract_strided_slice %1 {offsets = [0, 2], sizes = [16, 1], strides = [1, 1]} : vector<32x8xf32> to vector<16x1xf32>
    %5 = vector.extract_strided_slice %1 {offsets = [0, 3], sizes = [16, 1], strides = [1, 1]} : vector<32x8xf32> to vector<16x1xf32>
    %6 = vector.extract_strided_slice %1 {offsets = [0, 4], sizes = [1, 1], strides = [1, 1]} : vector<32x8xf32> to vector<1x1xf32>
    %7 = vector.broadcast %2 : vector<32x1xf32> to vector<32x250xf32>
    %8 = vector.broadcast %0 : vector<1x250xf32> to vector<32x250xf32>
    %9 = arith.mulf %7, %8 : vector<32x250xf32>
    %10 = vector.broadcast %3 : vector<32x1xf32> to vector<32x250xf32>
    %11 = arith.addf %9, %10 : vector<32x250xf32>
    %cst = arith.constant 0.000000e+00 : f32
    %12 = vector.broadcast %cst : f32 to vector<32x250xf32>
    %13 = arith.maximumf %11, %12 : vector<32x250xf32>
    %c0_3 = arith.constant 0 : index
    %c0_4 = arith.constant 0 : index
    %14 = vector.load %arg3[%c0_3, %c0_4] : memref<16x32xf32, #tpu.memory_space<vmem>>, vector<16x32xf32>
    %cst_5 = arith.constant dense<0.000000e+00> : vector<16x250xf32>
    %15 = tpu.matmul %14, %13, %cst_5 {dimension_numbers = #tpu.dot_dimension_numbers<[1], [0], [0], [1], [0, 0, 1, 1], [], []>, precision = #tpu.contract_precision<fp32>} : vector<16x32xf32>, vector<32x250xf32>, vector<16x250xf32> -> vector<16x250xf32>
    %16 = vector.broadcast %4 : vector<16x1xf32> to vector<16x250xf32>
    %17 = arith.addf %15, %16 : vector<16x250xf32>
    %cst_6 = arith.constant 0.000000e+00 : f32
    %18 = vector.broadcast %cst_6 : f32 to vector<16x250xf32>
    %19 = arith.maximumf %17, %18 : vector<16x250xf32>
    %20 = vector.broadcast %5 : vector<16x1xf32> to vector<16x250xf32>
    %21 = arith.mulf %20, %19 : vector<16x250xf32>
    %cst_7 = arith.constant dense<0.000000e+00> : vector<250xf32>
    %22 = vector.multi_reduction <add>, %21, %cst_7 [0] : vector<16x250xf32> to vector<250xf32>
    %23 = vector.shape_cast %22 : vector<250xf32> to vector<1x250xf32>
    %24 = vector.broadcast %6 : vector<1x1xf32> to vector<1x250xf32>
    %25 = arith.addf %23, %24 : vector<1x250xf32>
    %c0_8 = arith.constant 0 : index
    %c0_9 = arith.constant 0 : index
    %26 = vector.load %arg4[%c0_8, %c0_9] : memref<1x250xf32, #tpu.memory_space<vmem>>, vector<1x250xf32>
    tpu.vector_store %arg4[%c0_8, %c0_9], %25 {strides = array<i32>} : memref<1x250xf32, #tpu.memory_space<vmem>>, vector<1x250xf32>,
    return
  }
  func.func @transform_0(%arg0: i32) -> (i32, i32) {
    %c0_i32 = arith.constant 0 : i32
    %c0_i32_0 = arith.constant 0 : i32
    %c0_i32_1 = arith.constant 0 : i32
    return %c0_i32, %c0_i32_0 : i32, i32
  }
  func.func @transform_1(%arg0: i32) -> (i32, i32) {
    %c0_i32 = arith.constant 0 : i32
    %c0_i32_0 = arith.constant 0 : i32
    %c0_i32_1 = arith.constant 0 : i32
    return %c0_i32, %c0_i32_0 : i32, i32
  }
  func.func @transform_2(%arg0: i32) -> (i32, i32) {
    %c0_i32 = arith.constant 0 : i32
    %c0_i32_0 = arith.constant 0 : i32
    %c0_i32_1 = arith.constant 0 : i32
    return %c0_i32, %c0_i32_0 : i32, i32
  }
  func.func @transform_3(%arg0: i32) -> (i32, i32) {
    %c0_i32 = arith.constant 0 : i32
    %c0_i32_0 = arith.constant 0 : i32
    %c0_i32_1 = arith.constant 0 : i32
    return %c0_i32, %c0_i32_0 : i32, i32
  }
}

</mosaic_0001>

<bundles_post_ra>
// kernel: model2_forward.1
= control target key start
LH: loop header
LB: loop body
LE: loop exit
PB: predicated region body
PF: predicated region fallthrough
CT: control target
= control target key end

     0   :  { %v889_v1 = vmov 1   ;;  %v890_v2 = vmov 0   ;;  %s1037_s0 = inlined_call_operand.vmem [shape: f32[1,250], index: 0, kind: input, shape index: {}]   ;;  %s1038_s1 = inlined_call_operand.vmem [shape: f32[32,8], index: 1, kind: input, shape index: {}]   ;;  %s1039_s2 = inlined_call_operand.vmem [shape: f32[16,32], index: 2, kind: input, shape index: {}]   ;;  %s1040_s3 = inlined_call_operand.hbm [shape: f32[1,250], index: 3, kind: output, shape index: {}]  }
   0x1   :  { %v16_v0 = vld [vmem:[%s1038_s1] sm:$0xff]  ;;  %857 = vset.pattern.permute.xlu1 %v889_v1  ;;  %856 = vset.pattern.permute.xlu0 %v890_v2 }
   0x2   :  { %8 = vsyncpa [#allocation3], 0  ;;  %60 = vperm.xlu1 %857, %v16_v0   ;;  %22 = vperm.xlu0 %856, %v16_v0   ;;  %v17_v3 = vld [vmem:[%s1038_s1 + $0x8] sm:$0xff]  ;;  %v18_v4 = vld [vmem:[%s1038_s1 + $0x10] sm:$0xff]  ;;  %v891_v6 = vmov 0.0   ;;  %v892_v7 = vmov 2   ;;  %v41_v10 = vlaneseq }
   0x3   :  { %v19_v5 = vld [vmem:[%s1038_s1 + $0x18] sm:$0xff]  ;;  %180 = vmatprep.mubr.f32.mxu1 %v891_v6  ;;  %491 = vmatprep.mubr.f32.mxu0 %v891_v6  ;;  %v893_v8 = vmov 3   ;;  %v894_v9 = vmov 4   ;;  %v15_v14 = vld [vmem:[%s1037_s0] sm:$0x3]  ;;  %vm101_vm0 = vcmask 261120  }
   0x4   :  { %v932_v11 = vshrl.u32 %v41_v10, 7  ;;  %v91_v15 = vld [vmem:[%s1039_s2] sm:$0xff]  ;;  %v92_v28 = vld [vmem:[%s1039_s2 + $0x8] sm:$0xff]  ;;  %vm723_vm1 = vcmask 998400   ;;  %s896_s2 = smov [#allocation2]   ;;  %vm759_vm2 = vcmp.lt.s32.totalorder %v41_v10, 250 }
   0x5   :  { %v103_v18 = vsel %vm101_vm0, %v91_v15, 0  ;;  %v106_v37 = vsel %vm101_vm0, %v92_v28, 0  ;;  %s768_s24 = sshll.u32 %s896_s2, 4  ;;  %s769_s24 = int_to_ptr.vmem [resolvable:$true] %s768_s24 }
   0x6   :  { %64 = vperm.xlu1 %857, %v17_v3   ;;  %27 = vperm.xlu0 %856, %v17_v3   ;;  %v43_v12 = vsub.s32 0, %v932_v11  ;;  %v47_v13 = vsub.s32 1, %v932_v11  ;;  %v943_v23 = vand.u32 4294901760, %v103_v18  ;;  %v955_v45 = vand.u32 4294901760, %v106_v37  ;;  %s865_s25 = scalar_lea.vmem %s769_s24, 32  ;;  %p870_p1 = scmp.lt.s32.totalorder %s769_s24, %s769_s24 }
   0x7   :  { %p866_p0 = scmp.ne.s32.totalorder %s769_s24, %s865_s25  ;;  %p871_p2 = scmp.lt.s32.totalorder %s865_s25, %s865_s25 }
   0x8   :  { %v44_v16 = vrot.slane %v15_v14, %v43_v12  ;;  %v48_v17 = vrot.slane %v15_v14, %v47_v13  ;;  %v949_v33 = vsub.f32 %v103_v18, %v943_v23  ;;  %v972_v63 = vsub.f32 %v106_v37, %v955_v45 }
   0x9   :  { %p872_p3 = por %p871_p2, %p870_p1 }
   0xa   :  { %858 = vset.pattern.permute.xlu1 %v890_v2  ;;  %32 = vperm.xlu0 %856, %v18_v4   ;;  %v183_v44 = vand.u32 4294901760, %v949_v33 }
   0xb   :  { %37 = vperm.xlu1 %858, %v19_v5   ;;  %p873_p4 = pnand %p872_p3, %p866_p0 }
   0xc   :  { %v184_v62 = vsub.f32 %v949_v33, %v183_v44 }
   0xe   :  { %859 = vset.pattern.permute.xlu0 %v889_v1 }
   0xf   :  { %860 = vset.pattern.permute.xlu1 %v889_v1  ;;  %68 = vperm.xlu0 %859, %v18_v4  }
  0x10   :  { %72 = vperm.xlu1 %860, %v19_v5  }
  0x13   :  { %862 = vset.pattern.permute.xlu0 %v892_v7 }
  0x14   :  { %861 = vset.pattern.permute.xlu1 %v892_v7  ;;  %98 = vperm.xlu0 %862, %v17_v3  }
  0x15   :  { %94 = vperm.xlu1 %861, %v16_v0  }
  0x18   :  { %864 = vset.pattern.permute.xlu0 %v894_v9 }
  0x19   :  { %863 = vset.pattern.permute.xlu1 %v893_v8  ;;  %734 = vperm.xlu0 %864, %v16_v0  }
  0x1a   :  { %705 = vperm.xlu1 %863, %v16_v0  }
  0x1e   :  { %709 = vperm.xlu1 %863, %v17_v3  }
  0x81   :  { %v61_v19 = vpop.permute.xlu1 %60  ;;  %v23_v20 = vpop.permute.xlu0 %22 }
  0x82   :  { %v51_v21 = vmul.f32 %v44_v16, %v23_v20  ;;  %v52_v22 = vmul.f32 %v48_v17, %v23_v20 }
  0x84   :  { %v75_v24 = vadd.f32 %v61_v19, %v51_v21  ;;  %v76_v25 = vadd.f32 %v61_v19, %v52_v22  ;;  %v185_v21 = vand.u32 4294901760, %v184_v62 }
  0x85   :  { %v65_v26 = vpop.permute.xlu1 %64  ;;  %v28_v27 = vpop.permute.xlu0 %27 }
  0x86   :  { %v83_v29 = vmax.f32 %v75_v24, 0.0  ;;  %v84_v30 = vmax.f32 %v76_v25, 0.0  ;;  %v53_v31 = vmul.f32 %v44_v16, %v28_v27  ;;  %v54_v32 = vmul.f32 %v48_v17, %v28_v27 }
  0x88   :  { %v77_v34 = vadd.f32 %v65_v26, %v53_v31  ;;  %v78_v35 = vadd.f32 %v65_v26, %v54_v32  ;;  %v108_v36 = vand.u32 4294901760, %v84_v30  ;;  %v110_v39 = vand.u32 4294901760, %v83_v29 }
  0x89   :  { %v33_v38 = vpop.permute.xlu0 %32 }
  0x8a   :  { %v85_v40 = vmax.f32 %v77_v34, 0.0  ;;  %v86_v41 = vmax.f32 %v78_v35, 0.0  ;;  %v38_v42 = vpop.permute.xlu1 %37  ;;  %v952_v43 = vsub.f32 %v84_v30, %v108_v36  ;;  %v55_v46 = vmul.f32 %v44_v16, %v33_v38 }
  0x8b   :  { %v56_v47 = vmul.f32 %v48_v17, %v33_v38  ;;  %v57_v50 = vmul.f32 %v44_v16, %v38_v42  ;;  %v58_v51 = vmul.f32 %v48_v17, %v38_v42  ;;  %v957_v52 = vsub.f32 %v83_v29, %v110_v39 }
  0x8c   :  { %v112_v48 = vand.u32 4294901760, %v86_v41  ;;  %v114_v49 = vand.u32 4294901760, %v85_v40  ;;  %v205_v53 = vand.u32 4294901760, %v952_v43  ;;  %v194_v17 = vand.u32 4294901760, %v972_v63 }
  0x8d   :  { %v211_v8 = vand.u32 4294901760, %v957_v52 }
  0x8e   :  { %v69_v54 = vpop.permute.xlu0 %68  ;;  %v960_v55 = vpack.c.bf16 %v112_v48, %v108_v36  ;;  %v962_v56 = vsub.f32 %v86_v41, %v112_v48  ;;  %v964_v57 = vpack.c.bf16 %v114_v49, %v110_v39  ;;  %v966_v58 = vsub.f32 %v85_v40, %v114_v49 }
  0x8f   :  { %v79_v59 = vadd.f32 %v69_v54, %v55_v46  ;;  %v80_v60 = vadd.f32 %v69_v54, %v56_v47  ;;  %v73_v61 = vpop.permute.xlu1 %72  ;;  %v206_v7 = vsub.f32 %v952_v43, %v205_v53  ;;  %v212_v26 = vsub.f32 %v957_v52, %v211_v8 }
  0x90   :  { %v81_v0 = vadd.f32 %v73_v61, %v57_v50  ;;  %v82_v1 = vadd.f32 %v73_v61, %v58_v51  ;;  %777 = vmatprep.subr.bf16.mxu1 %v960_v55  ;;  %801 = vmatprep.subr.bf16.mxu0 %v960_v55  ;;  %v217_v2 = vand.u32 4294901760, %v962_v56  ;;  %v223_v3 = vand.u32 4294901760, %v966_v58 }
  0x91   :  { %v87_v4 = vmax.f32 %v79_v59, 0.0  ;;  %v88_v5 = vmax.f32 %v80_v60, 0.0  ;;  %779 = vmatpush1.bf16.msra.mxu1 %v964_v57  ;;  %803 = vmatpush1.bf16.msra.mxu0 %v964_v57  ;;  %v207_v25 = vand.u32 4294901760, %v206_v7  ;;  %v195_v35 = vsub.f32 %v972_v63, %v194_v17 }
  0x92   :  { %v89_v9 = vmax.f32 %v81_v0, 0.0  ;;  %v90_v12 = vmax.f32 %v82_v1, 0.0  ;;  %v218_v13 = vsub.f32 %v962_v56, %v217_v2  ;;  %v224_v16 = vsub.f32 %v966_v58, %v223_v3 }
  0x93   :  { %v116_v14 = vand.u32 4294901760, %v88_v5  ;;  %v118_v15 = vand.u32 4294901760, %v87_v4  ;;  %v808_v38 = vpack.c.bf16 %v217_v2, %v205_v53  ;;  %v213_v41 = vand.u32 4294901760, %v212_v26 }
  0x94   :  { %v120_v18 = vand.u32 4294901760, %v90_v12  ;;  %v122_v19 = vand.u32 4294901760, %v89_v9  ;;  %v219_v20 = vand.u32 4294901760, %v218_v13  ;;  %v225_v32 = vand.u32 4294901760, %v224_v16 }
  0x95   :  { %v228_v22 = vsub.f32 %v88_v5, %v116_v14  ;;  %v985_v24 = vsub.f32 %v87_v4, %v118_v15  ;;  %v810_v50 = vpack.c.bf16 %v223_v3, %v211_v8  ;;  %v196_v59 = vand.u32 4294901760, %v195_v35  ;;  %v99_v5 = vpop.permute.xlu0 %98 }
  0x96   :  { %v240_v27 = vsub.f32 %v90_v12, %v120_v18  ;;  %v988_v28 = vsub.f32 %v89_v9, %v122_v19  ;;  %v780_v29 = vpack.c.bf16 %v120_v18, %v116_v14  ;;  %v782_v30 = vpack.c.bf16 %v122_v19, %v118_v15 }
  0x97   :  { %v235_v31 = vand.u32 4294901760, %v985_v24  ;;  %v229_v34 = vand.u32 4294901760, %v228_v22  ;;  %v784_v37 = vpack.c.bf16 %v219_v20, %v207_v25  ;;  %v786_v49 = vpack.c.bf16 %v225_v32, %v213_v41 }
  0x98   :  { %v247_v36 = vand.u32 4294901760, %v988_v28  ;;  %781 = vmatprep.subr.bf16.mxu1 %v780_v29  ;;  %805 = vmatprep.subr.bf16.mxu0 %v780_v29  ;;  %v241_v39 = vand.u32 4294901760, %v240_v27  ;;  %v792_v1 = vpack.c.bf16 %v962_v56, %v952_v43  ;;  %v796_v2 = vpack.c.bf16 %v240_v27, %v228_v22 }
  0x99   :  { %v236_v40 = vsub.f32 %v985_v24, %v235_v31  ;;  %783 = vmatpush1.bf16.msra.mxu1 %v782_v30  ;;  %807 = vmatpush1.bf16.msra.mxu0 %v782_v30  ;;  %v230_v42 = vsub.f32 %v228_v22, %v229_v34  ;;  %v798_v43 = vpack.c.bf16 %v988_v28, %v985_v24  ;;  %v895_v35 = vmov 1966171168  }
  0x9a   :  { %v248_v46 = vsub.f32 %v988_v28, %v247_v36  ;;  %785 = vmatprep.subr.bf16.mxu1 %v784_v37  ;;  %809 = vmatprep.subr.bf16.mxu0 %v808_v38  ;;  %v242_v47 = vsub.f32 %v240_v27, %v241_v39  ;;  %v812_v53 = vpack.c.bf16 %v241_v39, %v229_v34 }
  0x9b   :  { %v237_v48 = vand.u32 4294901760, %v236_v40  ;;  %v231_v51 = vand.u32 4294901760, %v230_v42  ;;  %v814_v0 = vpack.c.bf16 %v247_v36, %v235_v31  ;;  %v743_v36 = vunpack.c.l.s4 %v895_v35 }
  0x9c   :  { %v249_v54 = vand.u32 4294901760, %v248_v46  ;;  %186 = vmatmul.mubr.f32.vlgmr.msra.gmra.mrb[0].mxu1 %v185_v21  ;;  %495 = vmatmul.mubr.f32.vlgmr.msra.gmra.mrb[0].mxu0 %v183_v44  ;;  %v243_v60 = vand.u32 4294901760, %v242_v47  ;;  %v794_v44 = vpack.c.bf16 %v966_v58, %v957_v52  ;;  %v95_v52 = vpop.permute.xlu1 %94  ;;  %v735_v47 = vpop.permute.xlu0 %734 }
  0x9d   :  { %787 = vmatpush1.bf16.msra.mxu1 %v786_v49  ;;  %811 = vmatpush1.bf16.msra.mxu0 %v810_v50  ;;  %v744_v41 = vunpack.c.0.s8 %v743_v36 }
  0x9e   :  { %813 = vmatprep.subr.bf16.mxu0 %v812_v53  ;;  %191 = vmatprep.mubr.f32.mxu1 %v891_v6  ;;  %v788_v61 = vpack.c.bf16 %v243_v60, %v231_v51  ;;  %v790_v62 = vpack.c.bf16 %v249_v54, %v237_v48 }
  0x9f   :  { %500 = vmatprep.mubr.f32.mxu0 %v891_v6  ;;  %v747_v49 = vsub.s32 %v744_v41, %v932_v11 }
  0xa0   :  { %197 = vmatmul.mubr.f32.gmra.mrb[2].mxu1 %v196_v59  ;;  %789 = vmatprep.subr.bf16.mxu1 %v788_v61  ;;  %v706_v8 = vpop.permute.xlu1 %705 }
  0xa1   :  { %504 = vmatmul.mubr.f32.gmra.mrb[2].mxu0 %v194_v17  ;;  %791 = vmatpush1.bf16.msra.mxu1 %v790_v62 }
  0xa2   :  { %815 = vmatpush1.bf16.msra.mxu0 %v814_v0  ;;  %793 = vmatprep.subr.bf16.mxu1 %v792_v1 }
  0xa3   :  { %817 = vmatprep.subr.bf16.mxu0 %v960_v55  ;;  %307 = vmatprep.mubr.f32.mxu1 %v891_v6 }
  0xa4   :  { %598 = vmatprep.mubr.f32.mxu0 %v891_v6  ;;  %309 = vmatmul.mubr.f32.vlgmr.msra.gmra.mrb[0].mxu1 %v943_v23  ;;  %v710_v20 = vpop.permute.xlu1 %709 }
  0xa5   :  { %600 = vmatmul.mubr.f32.vlgmr.msra.gmra.mrb[0].mxu0 %v943_v23  ;;  %795 = vmatpush1.bf16.msra.mxu1 %v794_v44 }
  0xa6   :  { %819 = vmatpush1.bf16.msra.mxu0 %v964_v57  ;;  %797 = vmatprep.subr.bf16.mxu1 %v796_v2 }
  0xa7   :  { %821 = vmatprep.subr.bf16.mxu0 %v780_v29  ;;  %314 = vmatprep.mubr.f32.mxu1 %v891_v6 }
  0xa8   :  { %605 = vmatprep.mubr.f32.mxu0 %v891_v6  ;;  %316 = vmatmul.mubr.f32.gmra.mrb[2].mxu1 %v955_v45 }
  0xa9   :  { %607 = vmatmul.mubr.f32.gmra.mrb[2].mxu0 %v955_v45  ;;  %799 = vmatpush1.bf16.msra.mxu1 %v798_v43 }
  0xaa   :  { %823 = vmatpush1.bf16.msra.mxu0 %v782_v30  ;;  %402 = vmatprep.mubr.f32.mxu1 %v891_v6 }
  0xab   :  { %685 = vmatprep.mubr.f32.mxu0 %v891_v6 }
  0xac   :  { %405 = vmatmul.mubr.f32.vlgmr.msra.gmra.mrb[0].mxu1 %v949_v33 }
  0xad   :  { %687 = vmatmul.mubr.f32.vlgmr.msra.gmra.mrb[0].mxu0 %v943_v23  ;;  %410 = vmatprep.mubr.f32.mxu1 %v891_v6 }
  0xae   :  { %692 = vmatprep.mubr.f32.mxu0 %v891_v6 }
  0xb0   :  { %413 = vmatmul.mubr.f32.gmra.mrb[2].mxu1 %v972_v63 }
  0xb1   :  { %694 = vmatmul.mubr.f32.gmra.mrb[2].mxu0 %v955_v45 }
 0x17f   :  { %v406_v55 = vpop.f32.mrb[0].mxu1 }
 0x180   :  { %v824_v56 = vadd.f32 %v406_v55, %v95_v52  ;;  %v688_v57 = vpop.f32.mrb[0].mxu0  ;;  %v408_v58 = vpop.f32.mrb[1].mxu1 }
 0x181   :  { %v826_v3 = vadd.f32 %v408_v58, %v95_v52  ;;  %v690_v4 = vpop.f32.mrb[1].mxu0 }
 0x182   :  { %v825_v7 = vadd.f32 %v824_v56, %v688_v57 }
 0x183   :  { %v827_v33 = vadd.f32 %v826_v3, %v690_v4  ;;  %v414_v23 = vpop.f32.mrb[2].mxu1 }
 0x184   :  { %v828_v9 = vadd.f32 %v414_v23, %v99_v5  ;;  %v695_v12 = vpop.f32.mrb[2].mxu0  ;;  %v416_v13 = vpop.f32.mrb[3].mxu1  ;;  %v700_v15 = vmax.f32 %v825_v7, 0.0 }
 0x185   :  { %v701_v6 = vmax.f32 %v827_v33, 0.0  ;;  %v830_v14 = vadd.f32 %v416_v13, %v99_v5  ;;  %v697_v63 = vpop.f32.mrb[3].mxu0 }
 0x186   :  { %v829_v45 = vadd.f32 %v828_v9, %v695_v12  ;;  %v712_v21 = vmul.f32 %v706_v8, %v700_v15 }
 0x187   :  { %v831_v16 = vadd.f32 %v830_v14, %v697_v63  ;;  %v713_v18 = vmul.f32 %v706_v8, %v701_v6 }
 0x188   :  { %v702_v17 = vmax.f32 %v829_v45, 0.0 }
 0x189   :  { %v703_v19 = vmax.f32 %v831_v16, 0.0  ;;  %v724_v26 = vsel %vm723_vm1, %v713_v18, 0.0 }
 0x18a   :  { %v714_v22 = vmul.f32 %v710_v20, %v702_v17 }
 0x18b   :  { %v715_v24 = vmul.f32 %v710_v20, %v703_v19 }
 0x18c   :  { %v716_v25 = vadd.f32 %v714_v22, %v712_v21 }
 0x18d   :  { %v725_v27 = vsel %vm723_vm1, %v715_v24, 0.0 }
 0x18e   :  { %v717_v28 = vrot.slane %v716_v25, 4  ;;  %v726_v29 = vadd.f32 %v725_v27, %v724_v26 }
 0x190   :  { %v718_v30 = vadd.f32 %v717_v28, %v716_v25  ;;  %v727_v31 = vrot.slane %v726_v29, 4 }
 0x192   :  { %v728_v32 = vadd.f32 %v727_v31, %v726_v29  ;;  %v719_v34 = vrot.slane %v718_v30, 2 }
 0x194   :  { %v720_v37 = vadd.f32 %v719_v34, %v718_v30  ;;  %v729_v38 = vrot.slane %v728_v32, 2 }
 0x196   :  { %v721_v39 = vrot.slane %v720_v37, 1  ;;  %v730_v40 = vadd.f32 %v729_v38, %v728_v32 }
 0x198   :  { %v722_v42 = vadd.f32 %v721_v39, %v720_v37  ;;  %v731_v46 = vrot.slane %v730_v40, 1 }
 0x19a   :  { %v732_v48 = vadd.f32 %v731_v46, %v730_v40  ;;  %v737_v50 = vadd.f32 %v735_v47, %v722_v42 }
 0x19c   :  { %v738_v51 = vadd.f32 %v735_v47, %v732_v48 }
 0x19e   :  { %v741_v54 = vcombine.low %v737_v50, %v738_v51 }
 0x1a0   :  { %v748_v53 = vrot.slane %v741_v54, %v747_v49 }
 0x1a2   :  { %v755_v59 = vrot.slane %v748_v53, %v747_v49 }
 0x1a4   :  { %761 = vst.msk [vmem:[#allocation2] sm:$0x3] %vm759_vm2, %v755_v59 }
 0x1a5   :  { %876 = shalt.err (!%p873_p4)
}
 0x1a6   :  { %s877_s28 = scalar_lea.hbm %s1040_s3, 32 }
 0x1a7   :  { %p878_p5 = scmp.ne.s32.totalorder %s1040_s3, %s877_s28  ;;  %p881_p6 = scmp.lt.u32.totalorder %s877_s28, %s1040_s3 }
 0x1a9   :  { %p883_p7 = pnand %p881_p6, %p878_p5 }
 0x1ab   :  { %886 = shalt.err (!%p883_p7)
}
 0x1ac   :  { %771 = dma.vmem_to_hbm [thread:$0]  %s769_s24, 32, %s1040_s3, [#allocation3]  }
 0x1ad   :  { %887 = dma.done.wait [#allocation3], 32  }
 0x1ae   :  { %888 = vsyncadd [#allocation3], 4294967264 }
 0x1af   :  { %775 = vsyncpa [#allocation3], 1 }

</bundles_post_ra>
